<compile_context>
chip_gen: v6e
topology: v6e:2x2x1
jax: 0.10.0
libtpu: 0.0.40
codegen_flags: <defaults>
</compile_context>

<pallas_src>
import functools

import jax
import jax.numpy as jnp
from jax.experimental import pallas as pl
from jax.experimental.pallas import tpu as pltpu

LANE = 128


def _round_up(n, m):
    return ((n + m - 1) // m) * m


def _pad_to(a, shape):
    pads = [(0, t - s) for s, t in zip(a.shape, shape)]
    return jnp.pad(a, pads)


def mlp_kernel(x_ref,
               w1_ref, b1_ref,
               w2_ref, b2_ref,
               w3_ref, b3_ref,
               w4_ref, b4_ref,
               o_ref):
    # x arrives as f32; cast to bf16 in-kernel (VPU op, nearly free) so HBM only
    # ever carries x once, as f32.
    x = x_ref[...].astype(jnp.bfloat16)
    # hidden1: bf16 MXU matmul, f32 accumulate; bias-add + ReLU in f32 (v5e-safe VPU).
    h = jnp.dot(x, w1_ref[...], preferred_element_type=jnp.float32)
    h = jnp.maximum(h + b1_ref[...], 0.0)
    # hidden2
    h = jnp.dot(h.astype(jnp.bfloat16), w2_ref[...],
                preferred_element_type=jnp.float32)
    h = jnp.maximum(h + b2_ref[...], 0.0)
    # hidden3
    h = jnp.dot(h.astype(jnp.bfloat16), w3_ref[...],
                preferred_element_type=jnp.float32)
    h = jnp.maximum(h + b3_ref[...], 0.0)
    # output layer (no activation)
    h = jnp.dot(h.astype(jnp.bfloat16), w4_ref[...],
                preferred_element_type=jnp.float32)
    o_ref[...] = (h + b4_ref[...]).astype(o_ref.dtype)


def prepare_params(params):
    """Pad weights/biases to lane multiples and cast weights to bf16 ONCE.

    Call this outside the inference/training step so the per-call forward does
    not repeatedly re-pad / re-cast every weight matrix.
    Returns (padded_params, d_out).
    """
    padded = []
    for w, b in params:
        wp = _pad_to(w, (_round_up(w.shape[0], LANE), _round_up(w.shape[1], LANE)))
        bp = _pad_to(b.reshape(1, -1), (1, _round_up(b.shape[-1], LANE)))
        padded.append((wp.astype(jnp.bfloat16), bp.astype(jnp.float32)))
    d_out = params[-1][0].shape[1]
    return tuple(padded), d_out


def _const_spec(shape):
    # Weights / biases: same block every grid step -> DMA once, single resident buffer.
    try:
        return pl.BlockSpec(shape, lambda i: (0, 0), pipeline_mode=pl.Buffered(1))
    except TypeError:  # older jax without pipeline_mode: fall back to default buffering
        return pl.BlockSpec(shape, lambda i: (0, 0))


@functools.partial(jax.jit, static_argnames=("d_out", "tb"))
def mlp_forward(x, padded_params, *, d_out, tb=512):
    """x: [B, D_in] float32; padded_params: output of prepare_params()."""
    (w1p, b1p), (w2p, b2p), (w3p, b3p), (w4p, b4p) = padded_params
    B, D_in = x.shape
    Dip = w1p.shape[0]
    H1p, H2p, H3p, Dop = w1p.shape[1], w2p.shape[1], w3p.shape[1], w4p.shape[1]

    # Batch tile: multiple of 8 (f32 sublanes), capped at `tb`.
    TB = min(tb, _round_up(max(B, 1), 8))
    # v7x has 2 TensorCores: make the "parallel" batch axis at least 2 grid steps
    # whenever the batch is big enough to split.
    if B >= 16 and _round_up(B, TB) // TB < 2:
        TB = _round_up((B + 1) // 2, 8)
    Bp = _round_up(B, TB)

    # Activations stay f32; pad batch to a tile multiple and features up to the
    # (already lane-padded) weight K dim.  Zero-width pads are free.
    xp = _pad_to(x.astype(jnp.float32), (Bp, Dip))

    grid = (Bp // TB,)

    # Explicit VMEM budget: resident weights/biases + double-buffered x/out tiles
    # + f32 intermediate staging, with headroom (cap at 64 MiB to stay v7x-safe).
    weight_bytes = sum(w.size * w.dtype.itemsize + b.size * b.dtype.itemsize
                       for w, b in padded_params)
    io_bytes = 2 * (TB * Dip * 4 + TB * Dop * 4)
    staging_bytes = 4 * TB * max(H1p, H2p, H3p, Dop) * 4
    vmem_limit = int(min(max(1.5 * (weight_bytes + io_bytes + staging_bytes) + (4 << 20),
                             16 << 20), 64 << 20))

    flops = 2 * Bp * (Dip * H1p + H1p * H2p + H2p * H3p + H3p * Dop)
    bytes_accessed = xp.size * 4 + weight_bytes + Bp * Dop * 4

    out = pl.pallas_call(
        mlp_kernel,
        out_shape=jax.ShapeDtypeStruct((Bp, Dop), jnp.float32),
        grid=grid,
        in_specs=[
            pl.BlockSpec((TB, Dip), lambda i: (i, 0)),   # activations: tiled over batch
            _const_spec((Dip, H1p)), _const_spec((1, H1p)),
            _const_spec((H1p, H2p)), _const_spec((1, H2p)),
            _const_spec((H2p, H3p)), _const_spec((1, H3p)),
            _const_spec((H3p, Dop)), _const_spec((1, Dop)),
        ],
        out_specs=pl.BlockSpec((TB, Dop), lambda i: (i, 0)),
        compiler_params=pltpu.CompilerParams(
            dimension_semantics=("parallel",),
            vmem_limit_bytes=vmem_limit,
        ),
        cost_estimate=pl.CostEstimate(
            flops=int(flops),
            transcendentals=0,
            bytes_accessed=int(bytes_accessed),
        ),
    )(xp, w1p, b1p, w2p, b2p, w3p, b3p, w4p, b4p)

    # Strip batch and lane padding.
    return out[:B, :d_out]


def init_linear(key, fan_in, fan_out):
    # Deterministic init mimicking nn.Linear's U(-1/sqrt(fan_in), 1/sqrt(fan_in)).
    kw, kb = jax.random.split(key)
    bound = 1.0 / jnp.sqrt(jnp.float32(fan_in))
    w = jax.random.uniform(kw, (fan_in, fan_out), jnp.float32, -bound, bound)
    b = jax.random.uniform(kb, (1, fan_out), jnp.float32, -bound, bound)
    return w, b


def ref_forward_bf16(x, params):
    # Plain-JAX reference with the same bf16-matmul / f32-accumulate recipe.
    h = x
    for i, (w, b) in enumerate(params):
        h = jnp.dot(h.astype(jnp.bfloat16), w.astype(jnp.bfloat16),
                    preferred_element_type=jnp.float32) + b
        if i < 3:
            h = jnp.maximum(h, 0.0)
    return h


def ref_forward_f32(x, params):
    # Pure-f32 reference matching the PyTorch module semantics.
    h = x
    for i, (w, b) in enumerate(params):
        h = h @ w + b
        if i < 3:
            h = jnp.maximum(h, 0.0)
    return h


if __name__ == "__main__":
    # Small shapes consistent with the module: D_in, H1, H2, H3, D_out.
    B, D_in, H1, H2, H3, D_out = 8, 32, 64, 48, 32, 16

    key = jax.random.PRNGKey(0)
    kx, k1, k2, k3, k4 = jax.random.split(key, 5)

    x = jax.random.normal(kx, (B, D_in), jnp.float32)
    params = [
        init_linear(k1, D_in, H1),
        init_linear(k2, H1, H2),
        init_linear(k3, H2, H3),
        init_linear(k4, H3, D_out),
    ]

    # One-time weight preparation (padding + bf16 cast), outside the jitted step.
    pparams, d_out = prepare_params(params)
    pparams = jax.block_until_ready(pparams)

    out = mlp_forward(x, pparams, d_out=d_out)
    out = jax.block_until_ready(out)

    assert out.shape == (B, D_out)
    # Matches the bf16-matmul / f32-accumulate recipe tightly ...
    ref_b = ref_forward_bf16(x, params)
    assert jnp.allclose(out, ref_b, atol=1e-3, rtol=1e-3), (
        float(jnp.max(jnp.abs(out - ref_b))))
    # ... and the pure-f32 PyTorch semantics up to bf16 matmul rounding.
    ref_f = ref_forward_f32(x, params)
    assert jnp.allclose(out, ref_f, atol=5e-2, rtol=5e-2), (
        float(jnp.max(jnp.abs(out - ref_f))))

    print("KERNEL_OK")
</pallas_src>

<mosaic_0001>
module attributes {stable_mosaic.version = 11 : i64} {
  func.func @mlp_kernel(%arg0: i32, %arg1: memref<8x128xf32, #tpu.memory_space<vmem>>, %arg2: memref<128x128xbf16, #tpu.memory_space<vmem>>, %arg3: memref<1x128xf32, #tpu.memory_space<vmem>>, %arg4: memref<128x128xbf16, #tpu.memory_space<vmem>>, %arg5: memref<1x128xf32, #tpu.memory_space<vmem>>, %arg6: memref<128x128xbf16, #tpu.memory_space<vmem>>, %arg7: memref<1x128xf32, #tpu.memory_space<vmem>>, %arg8: memref<128x128xbf16, #tpu.memory_space<vmem>>, %arg9: memref<1x128xf32, #tpu.memory_space<vmem>>, %arg10: memref<8x128xf32, #tpu.memory_space<vmem>>) attributes {dimension_semantics = [#tpu.dimension_semantics<parallel>], iteration_bounds = array<i64: 1>, scalar_prefetch = 0 : i64, scratch_operands = 0 : i64, tpu.core_type = #tpu.core_type<tc>, window_params = [{transform_indices = @transform_0, window_bounds = array<i64: 8, 128>}, {pipeline_mode = #tpu.pipeline_mode<synchronous>, transform_indices = @transform_1, window_bounds = array<i64: 128, 128>}, {pipeline_mode = #tpu.pipeline_mode<synchronous>, transform_indices = @transform_2, window_bounds = array<i64: 1, 128>}, {pipeline_mode = #tpu.pipeline_mode<synchronous>, transform_indices = @transform_3, window_bounds = array<i64: 128, 128>}, {pipeline_mode = #tpu.pipeline_mode<synchronous>, transform_indices = @transform_4, window_bounds = array<i64: 1, 128>}, {pipeline_mode = #tpu.pipeline_mode<synchronous>, transform_indices = @transform_5, window_bounds = array<i64: 128, 128>}, {pipeline_mode = #tpu.pipeline_mode<synchronous>, transform_indices = @transform_6, window_bounds = array<i64: 1, 128>}, {pipeline_mode = #tpu.pipeline_mode<synchronous>, transform_indices = @transform_7, window_bounds = array<i64: 128, 128>}, {pipeline_mode = #tpu.pipeline_mode<synchronous>, transform_indices = @transform_8, window_bounds = array<i64: 1, 128>}, {transform_indices = @transform_9, window_bounds = array<i64: 8, 128>}]} {
    %c0 = arith.constant 0 : index
    %c0_0 = arith.constant 0 : index
    %0 = vector.load %arg1[%c0, %c0_0] : memref<8x128xf32, #tpu.memory_space<vmem>>, vector<8x128xf32>
    %1 = arith.truncf %0 : vector<8x128xf32> to vector<8x128xbf16>
    %c0_1 = arith.constant 0 : index
    %c0_2 = arith.constant 0 : index
    %2 = vector.load %arg2[%c0_1, %c0_2] : memref<128x128xbf16, #tpu.memory_space<vmem>>, vector<128x128xbf16>
    %cst = arith.constant dense<0.000000e+00> : vector<8x128xf32>
    %3 = tpu.matmul %1, %2, %cst {dimension_numbers = #tpu.dot_dimension_numbers<[1], [0], [0], [1], [0, 0, 1, 1], [], []>} : vector<8x128xbf16>, vector<128x128xbf16>, vector<8x128xf32> -> vector<8x128xf32>
    %c0_3 = arith.constant 0 : index
    %c0_4 = arith.constant 0 : index
    %4 = vector.load %arg3[%c0_3, %c0_4] : memref<1x128xf32, #tpu.memory_space<vmem>>, vector<1x128xf32>
    %5 = vector.broadcast %4 : vector<1x128xf32> to vector<8x128xf32>
    %6 = arith.addf %3, %5 : vector<8x128xf32>
    %cst_5 = arith.constant 0.000000e+00 : f32
    %7 = vector.broadcast %cst_5 : f32 to vector<8x128xf32>
    %8 = arith.maximumf %6, %7 : vector<8x128xf32>
    %9 = arith.truncf %8 : vector<8x128xf32> to vector<8x128xbf16>
    %c0_6 = arith.constant 0 : index
    %c0_7 = arith.constant 0 : index
    %10 = vector.load %arg4[%c0_6, %c0_7] : memref<128x128xbf16, #tpu.memory_space<vmem>>, vector<128x128xbf16>
    %cst_8 = arith.constant dense<0.000000e+00> : vector<8x128xf32>
    %11 = tpu.matmul %9, %10, %cst_8 {dimension_numbers = #tpu.dot_dimension_numbers<[1], [0], [0], [1], [0, 0, 1, 1], [], []>} : vector<8x128xbf16>, vector<128x128xbf16>, vector<8x128xf32> -> vector<8x128xf32>
    %c0_9 = arith.constant 0 : index
    %c0_10 = arith.constant 0 : index
    %12 = vector.load %arg5[%c0_9, %c0_10] : memref<1x128xf32, #tpu.memory_space<vmem>>, vector<1x128xf32>
    %13 = vector.broadcast %12 : vector<1x128xf32> to vector<8x128xf32>
    %14 = arith.addf %11, %13 : vector<8x128xf32>
    %cst_11 = arith.constant 0.000000e+00 : f32
    %15 = vector.broadcast %cst_11 : f32 to vector<8x128xf32>
    %16 = arith.maximumf %14, %15 : vector<8x128xf32>
    %17 = arith.truncf %16 : vector<8x128xf32> to vector<8x128xbf16>
    %c0_12 = arith.constant 0 : index
    %c0_13 = arith.constant 0 : index
    %18 = vector.load %arg6[%c0_12, %c0_13] : memref<128x128xbf16, #tpu.memory_space<vmem>>, vector<128x128xbf16>
    %cst_14 = arith.constant dense<0.000000e+00> : vector<8x128xf32>
    %19 = tpu.matmul %17, %18, %cst_14 {dimension_numbers = #tpu.dot_dimension_numbers<[1], [0], [0], [1], [0, 0, 1, 1], [], []>} : vector<8x128xbf16>, vector<128x128xbf16>, vector<8x128xf32> -> vector<8x128xf32>
    %c0_15 = arith.constant 0 : index
    %c0_16 = arith.constant 0 : index
    %20 = vector.load %arg7[%c0_15, %c0_16] : memref<1x128xf32, #tpu.memory_space<vmem>>, vector<1x128xf32>
    %21 = vector.broadcast %20 : vector<1x128xf32> to vector<8x128xf32>
    %22 = arith.addf %19, %21 : vector<8x128xf32>
    %cst_17 = arith.constant 0.000000e+00 : f32
    %23 = vector.broadcast %cst_17 : f32 to vector<8x128xf32>
    %24 = arith.maximumf %22, %23 : vector<8x128xf32>
    %25 = arith.truncf %24 : vector<8x128xf32> to vector<8x128xbf16>
    %c0_18 = arith.constant 0 : index
    %c0_19 = arith.constant 0 : index
    %26 = vector.load %arg8[%c0_18, %c0_19] : memref<128x128xbf16, #tpu.memory_space<vmem>>, vector<128x128xbf16>
    %cst_20 = arith.constant dense<0.000000e+00> : vector<8x128xf32>
    %27 = tpu.matmul %25, %26, %cst_20 {dimension_numbers = #tpu.dot_dimension_numbers<[1], [0], [0], [1], [0, 0, 1, 1], [], []>} : vector<8x128xbf16>, vector<128x128xbf16>, vector<8x128xf32> -> vector<8x128xf32>
    %c0_21 = arith.constant 0 : index
    %c0_22 = arith.constant 0 : index
    %28 = vector.load %arg9[%c0_21, %c0_22] : memref<1x128xf32, #tpu.memory_space<vmem>>, vector<1x128xf32>
    %29 = vector.broadcast %28 : vector<1x128xf32> to vector<8x128xf32>
    %30 = arith.addf %27, %29 : vector<8x128xf32>
    %c0_23 = arith.constant 0 : index
    %c0_24 = arith.constant 0 : index
    %31 = vector.load %arg10[%c0_23, %c0_24] : memref<8x128xf32, #tpu.memory_space<vmem>>, vector<8x128xf32>
    tpu.vector_store %arg10[%c0_23, %c0_24], %30 {strides = array<i32>} : memref<8x128xf32, #tpu.memory_space<vmem>>, vector<8x128xf32>,
    return
  }
  func.func @transform_0(%arg0: i32) -> (i32, i32) {
    %c0_i32 = arith.constant 0 : i32
    %c0_i32_0 = arith.constant 0 : i32
    return %arg0, %c0_i32 : i32, i32
  }
  func.func @transform_1(%arg0: i32) -> (i32, i32) {
    %c0_i32 = arith.constant 0 : i32
    %c0_i32_0 = arith.constant 0 : i32
    %c0_i32_1 = arith.constant 0 : i32
    return %c0_i32, %c0_i32_0 : i32, i32
  }
  func.func @transform_2(%arg0: i32) -> (i32, i32) {
    %c0_i32 = arith.constant 0 : i32
    %c0_i32_0 = arith.constant 0 : i32
    %c0_i32_1 = arith.constant 0 : i32
    return %c0_i32, %c0_i32_0 : i32, i32
  }
  func.func @transform_3(%arg0: i32) -> (i32, i32) {
    %c0_i32 = arith.constant 0 : i32
    %c0_i32_0 = arith.constant 0 : i32
    %c0_i32_1 = arith.constant 0 : i32
    return %c0_i32, %c0_i32_0 : i32, i32
  }
  func.func @transform_4(%arg0: i32) -> (i32, i32) {
    %c0_i32 = arith.constant 0 : i32
    %c0_i32_0 = arith.constant 0 : i32
    %c0_i32_1 = arith.constant 0 : i32
    return %c0_i32, %c0_i32_0 : i32, i32
  }
  func.func @transform_5(%arg0: i32) -> (i32, i32) {
    %c0_i32 = arith.constant 0 : i32
    %c0_i32_0 = arith.constant 0 : i32
    %c0_i32_1 = arith.constant 0 : i32
    return %c0_i32, %c0_i32_0 : i32, i32
  }
  func.func @transform_6(%arg0: i32) -> (i32, i32) {
    %c0_i32 = arith.constant 0 : i32
    %c0_i32_0 = arith.constant 0 : i32
    %c0_i32_1 = arith.constant 0 : i32
    return %c0_i32, %c0_i32_0 : i32, i32
  }
  func.func @transform_7(%arg0: i32) -> (i32, i32) {
    %c0_i32 = arith.constant 0 : i32
    %c0_i32_0 = arith.constant 0 : i32
    %c0_i32_1 = arith.constant 0 : i32
    return %c0_i32, %c0_i32_0 : i32, i32
  }
  func.func @transform_8(%arg0: i32) -> (i32, i32) {
    %c0_i32 = arith.constant 0 : i32
    %c0_i32_0 = arith.constant 0 : i32
    %c0_i32_1 = arith.constant 0 : i32
    return %c0_i32, %c0_i32_0 : i32, i32
  }
  func.func @transform_9(%arg0: i32) -> (i32, i32) {
    %c0_i32 = arith.constant 0 : i32
    %c0_i32_0 = arith.constant 0 : i32
    return %arg0, %c0_i32 : i32, i32
  }
}

</mosaic_0001>

<bundles_post_ra>
// kernel: mlp_forward.1
= control target key start
LH: loop header
LB: loop body
LE: loop exit
PB: predicated region body
PF: predicated region fallthrough
CT: control target
= control target key end

     0   :  { %14 = vsyncpa [#allocation3], 0  ;;  %s1001_s0 = inlined_call_operand.vmem [shape: f32[8,128], index: 0, kind: input, shape index: {}]   ;;  %s1002_s1 = inlined_call_operand.hbm [shape: bf16[128,128], index: 1, kind: input, shape index: {}]   ;;  %s1003_s2 = inlined_call_operand.vmem [shape: f32[1,128], index: 2, kind: input, shape index: {}]   ;;  %s1004_s3 = inlined_call_operand.hbm [shape: bf16[128,128], index: 3, kind: input, shape index: {}]   ;;  %s1005_s4 = inlined_call_operand.vmem [shape: f32[1,128], index: 4, kind: input, shape index: {}]   ;;  %s1006_s5 = inlined_call_operand.hbm [shape: bf16[128,128], index: 5, kind: input, shape index: {}]   ;;  %s1007_s6 = inlined_call_operand.vmem [shape: f32[1,128], index: 6, kind: input, shape index: {}]   ;;  %s1008_s7 = inlined_call_operand.hbm [shape: bf16[128,128], index: 7, kind: input, shape index: {}]   ;;  %s1009_s8 = inlined_call_operand.vmem [shape: f32[1,128], index: 8, kind: input, shape index: {}]   ;;  %s1010_s9 = inlined_call_operand.hbm [shape: f32[8,128], index: 9, kind: output, shape index: {}]  }
   0x1   :  { %15 = vsyncpa [#allocation6], 0 }
   0x2   :  { %16 = vsyncpa [#allocation9], 0 }
   0x3   :  { %17 = vsyncpa [#allocation4], 0  ;;  %s860_s30 = smov [#allocation5]   ;;  %s861_s11 = smov [#allocation2]  }
   0x4   :  { %s39_s10 = sshll.u32 %s860_s30, 4  ;;  %s25_s12 = sshll.u32 %s861_s11, 4  ;;  %s40_s10 = int_to_ptr.vmem [resolvable:$true] %s39_s10  ;;  %s26_s12 = int_to_ptr.vmem [resolvable:$true] %s25_s12 }
   0x5   :  { %s760_s13 = scalar_lea.vmem %s40_s10, 1024  ;;  %p765_p1 = scmp.lt.s32.totalorder %s40_s10, %s40_s10 }
   0x6   :  { %p761_p0 = scmp.ne.s32.totalorder %s40_s10, %s760_s13  ;;  %p766_p2 = scmp.lt.s32.totalorder %s760_s13, %s760_s13 }
   0x8   :  { %p767_p3 = por %p766_p2, %p765_p1 }
   0xa   :  { %p768_p4 = pnand %p767_p3, %p761_p0 }
   0xc   :  { %771 = shalt.err (!%p768_p4)
}
   0xd   :  { %s862_s14 = smov 64   ;;  %s863_s15 = smov 4  }
   0xe   :  { %45 = dma.hbm_to_vmem [thread:$0]  %s1004_s3, 1024, %s40_s10, [#allocation6], %s862_s14, %s862_s14, %s863_s15  }
   0xf   :  { %s780_s18 = scalar_lea.vmem %s26_s12, 1024  ;;  %p785_p6 = scmp.lt.s32.totalorder %s26_s12, %s26_s12 }
  0x10   :  { %p781_p5 = scmp.ne.s32.totalorder %s26_s12, %s780_s18  ;;  %p786_p7 = scmp.lt.s32.totalorder %s780_s18, %s780_s18 }
  0x12   :  { %p787_p8 = por %p786_p7, %p785_p6 }
  0x14   :  { %p788_p9 = pnand %p787_p8, %p781_p5 }
  0x16   :  { %791 = shalt.err (!%p788_p9)
}
  0x17   :  { %31 = dma.hbm_to_vmem [thread:$0]  %s1002_s1, 1024, %s26_s12, [#allocation3], %s862_s14, %s862_s14, %s863_s15  }
  0x18   :  { %s864_s21 = smov [#allocation7]   ;;  %s865_s23 = smov [#allocation8]  }
  0x19   :  { %s53_s22 = sshll.u32 %s864_s21, 4  ;;  %s67_s24 = sshll.u32 %s865_s23, 4  ;;  %s54_s22 = int_to_ptr.vmem [resolvable:$true] %s53_s22  ;;  %s68_s24 = int_to_ptr.vmem [resolvable:$true] %s67_s24 }
  0x1a   :  { %s800_s3 = scalar_lea.vmem %s54_s22, 1024  ;;  %p805_p11 = scmp.lt.s32.totalorder %s54_s22, %s54_s22 }
  0x1b   :  { %p801_p10 = scmp.ne.s32.totalorder %s54_s22, %s800_s3  ;;  %p806_p12 = scmp.lt.s32.totalorder %s800_s3, %s800_s3 }
  0x1d   :  { %p807_p13 = por %p806_p12, %p805_p11 }
  0x1f   :  { %p808_p0 = pnand %p807_p13, %p801_p10 }
  0x21   :  { %811 = shalt.err (!%p808_p0)
}
  0x22   :  { %59 = dma.hbm_to_vmem [thread:$0]  %s1006_s5, 1024, %s54_s22, [#allocation6], %s862_s14, %s862_s14, %s863_s15  }
  0x23   :  { %s820_s1 = scalar_lea.vmem %s68_s24, 1024  ;;  %p825_p2 = scmp.lt.s32.totalorder %s68_s24, %s68_s24 }
  0x24   :  { %p821_p1 = scmp.ne.s32.totalorder %s68_s24, %s820_s1  ;;  %p826_p3 = scmp.lt.s32.totalorder %s820_s1, %s820_s1 }
  0x26   :  { %p827_p4 = por %p826_p3, %p825_p2 }
  0x28   :  { %p828_p5 = pnand %p827_p4, %p821_p1 }
  0x2a   :  { %831 = shalt.err (!%p828_p5)
}
  0x2b   :  { %73 = dma.hbm_to_vmem [thread:$0]  %s1008_s7, 1024, %s68_s24, [#allocation9], %s862_s14, %s862_s14, %s863_s15  }
  0x2c   :  { %852 = dma.done.wait [#allocation3], 1024  }
  0x2d   :  { %853 = vsyncadd [#allocation3], 4294966272 }
  0x2e   :  { %854 = dma.done.wait [#allocation6], 2048  }
  0x2f   :  { %855 = vsyncadd [#allocation6], 4294965248 }
  0x30   :  { %856 = dma.done.wait [#allocation9], 1024  }
  0x31   :  { %857 = vsyncadd [#allocation9], 4294966272  ;;  %v866_v0 = vmov 0.0   ;;  %vm867_vm0 = vmmov 0   ;;  %v720_v1 = vld [vmem:[#allocation2 + $0x38] sm:$0xff]   ;;  %v721_v2 = vld [vmem:[#allocation2 + $0x30] sm:$0xff]  }
  0x32   :  { %631 = vmatprep.subr.bf16.mxu0 %v866_v0  ;;  %647 = vmatprep.mubr.msk.bf16.mxu0 %vm867_vm0, %v866_v0  ;;  %v722_v3 = vld [vmem:[#allocation2 + $0x28] sm:$0xff]   ;;  %v728_v4 = vld [vmem:[#allocation5 + $0x38] sm:$0xff]   ;;  %v723_v5 = vld [vmem:[#allocation2 + $0x20] sm:$0xff]   ;;  %s868_s13 = smov [#allocation10]  }
  0x33   :  { %651 = vmatprep.subr.bf16.mxu1 %v866_v0  ;;  %667 = vmatprep.mubr.msk.bf16.mxu1 %vm867_vm0, %v866_v0  ;;  %v729_v6 = vld [vmem:[#allocation5 + $0x30] sm:$0xff]   ;;  %v724_v7 = vld [vmem:[#allocation2 + $0x18] sm:$0xff]   ;;  %v730_v8 = vld [vmem:[#allocation5 + $0x28] sm:$0xff]   ;;  %s548_s14 = sshll.u32 %s868_s13, 4  ;;  %s549_s14 = int_to_ptr.vmem [resolvable:$true] %s548_s14 }
  0x34   :  { %632 = vmatpush3.bf16.msra.mxu0 %v720_v1  ;;  %652 = vmatpush3.bf16.msra.mxu1 %v728_v4  ;;  %v725_v9 = vld [vmem:[#allocation2 + $0x10] sm:$0xff]   ;;  %v731_v10 = vld [vmem:[#allocation5 + $0x20] sm:$0xff]   ;;  %v726_v11 = vld [vmem:[#allocation2 + $0x8] sm:$0xff]   ;;  %p837_p7 = scmp.lt.s32.totalorder %s549_s14, %s549_s14 }
  0x35   :  { %633 = vmatprep.subr.bf16.mxu0 %v866_v0  ;;  %653 = vmatprep.subr.bf16.mxu1 %v866_v0  ;;  %v732_v12 = vld [vmem:[#allocation5 + $0x18] sm:$0xff]   ;;  %v727_v13 = vld [vmem:[#allocation2] sm:$0xff]   ;;  %v733_v15 = vld [vmem:[#allocation5 + $0x10] sm:$0xff]  }
  0x36   :  { %v89_v14 = vld [vmem:[%s1001_s0] sm:$0xff]  ;;  %v734_v17 = vld [vmem:[#allocation5 + $0x8] sm:$0xff]   ;;  %v736_v19 = vld [vmem:[#allocation7 + $0x38] sm:$0xff]  }
  0x37   :  { %v90_v16 = vpack.c.bf16 %v89_v14, %v89_v14  ;;  %v735_v18 = vld [vmem:[#allocation5] sm:$0xff]   ;;  %v737_v20 = vld [vmem:[#allocation7 + $0x30] sm:$0xff]   ;;  %v738_v21 = vld [vmem:[#allocation7 + $0x28] sm:$0xff]  }
  0x38   :  { %634 = vmatpush3.bf16.msra.mxu0 %v721_v2  ;;  %654 = vmatpush3.bf16.msra.mxu1 %v729_v6  ;;  %v739_v22 = vld [vmem:[#allocation7 + $0x20] sm:$0xff]   ;;  %v740_v23 = vld [vmem:[#allocation7 + $0x18] sm:$0xff]   ;;  %v741_v24 = vld [vmem:[#allocation7 + $0x10] sm:$0xff]  }
  0x39   :  { %635 = vmatprep.subr.bf16.mxu0 %v866_v0  ;;  %655 = vmatprep.subr.bf16.mxu1 %v866_v0  ;;  %v559_v25 = vld [vmem:[%s1003_s2] ss:$0 sm:$0xff]  ;;  %v742_v33 = vld [vmem:[#allocation7 + $0x8] sm:$0xff]   ;;  %v744_v35 = vld [vmem:[#allocation8 + $0x38] sm:$0xff]  }
  0x3a   :  { %v743_v34 = vld [vmem:[#allocation7] sm:$0xff]   ;;  %v745_v36 = vld [vmem:[#allocation8 + $0x30] sm:$0xff]   ;;  %v746_v37 = vld [vmem:[#allocation8 + $0x28] sm:$0xff]  }
  0x3b   :  { %v747_v38 = vld [vmem:[#allocation8 + $0x20] sm:$0xff]   ;;  %v748_v39 = vld [vmem:[#allocation8 + $0x18] sm:$0xff]   ;;  %v749_v40 = vld [vmem:[#allocation8 + $0x10] sm:$0xff]  }
  0x3c   :  { %636 = vmatpush3.bf16.msra.mxu0 %v722_v3  ;;  %656 = vmatpush3.bf16.msra.mxu1 %v730_v8  ;;  %v568_v41 = vld [vmem:[%s1005_s4] ss:$0 sm:$0xff]  ;;  %v750_v49 = vld [vmem:[#allocation8 + $0x8] sm:$0xff]  }
  0x3d   :  { %637 = vmatprep.subr.bf16.mxu0 %v866_v0  ;;  %657 = vmatprep.subr.bf16.mxu1 %v866_v0  ;;  %v751_v50 = vld [vmem:[#allocation8] sm:$0xff]  }
  0x3e   :  { %v577_v51 = vld [vmem:[%s1007_s6] ss:$0 sm:$0xff]  ;;  %s832_s6 = scalar_lea.vmem %s549_s14, 128 }
  0x3f   :  { %v586_v59 = vld [vmem:[%s1009_s8] ss:$0 sm:$0xff]  ;;  %p833_p6 = scmp.ne.s32.totalorder %s549_s14, %s832_s6  ;;  %p838_p8 = scmp.lt.s32.totalorder %s832_s6, %s832_s6 }
  0x40   :  { %638 = vmatpush3.bf16.msra.mxu0 %v723_v5  ;;  %658 = vmatpush3.bf16.msra.mxu1 %v731_v10 }
  0x41   :  { %639 = vmatprep.subr.bf16.mxu0 %v866_v0  ;;  %659 = vmatprep.subr.bf16.mxu1 %v866_v0  ;;  %p839_p9 = por %p838_p8, %p837_p7 }
  0x43   :  { %p840_p10 = pnand %p839_p9, %p833_p6 }
  0x44   :  { %640 = vmatpush3.bf16.msra.mxu0 %v724_v7  ;;  %660 = vmatpush3.bf16.msra.mxu1 %v732_v12 }
  0x45   :  { %641 = vmatprep.subr.bf16.mxu0 %v866_v0  ;;  %661 = vmatprep.subr.bf16.mxu1 %v866_v0 }
  0x48   :  { %642 = vmatpush3.bf16.msra.mxu0 %v725_v9  ;;  %662 = vmatpush3.bf16.msra.mxu1 %v733_v15 }
  0x49   :  { %643 = vmatprep.subr.bf16.mxu0 %v866_v0  ;;  %663 = vmatprep.subr.bf16.mxu1 %v866_v0 }
  0x4c   :  { %644 = vmatpush3.bf16.msra.mxu0 %v726_v11  ;;  %664 = vmatpush3.bf16.msra.mxu1 %v734_v17 }
  0x4d   :  { %645 = vmatprep.subr.bf16.mxu0 %v866_v0  ;;  %665 = vmatprep.subr.bf16.mxu1 %v866_v0 }
  0x50   :  { %646 = vmatpush3.bf16.msra.mxu0 %v727_v13  ;;  %666 = vmatpush3.bf16.msra.mxu1 %v735_v18 }
  0x51   :  { %671 = vmatprep.subr.bf16.mxu0 %v866_v0  ;;  %691 = vmatprep.subr.bf16.mxu1 %v866_v0 }
  0x53   :  { %648 = vmatmul.mubr.bf16.vlgmr.msra.gmra.mxu0 %v90_v16 }
  0x54   :  { %687 = vmatprep.mubr.msk.bf16.mxu0 %vm867_vm0, %v866_v0  ;;  %672 = vmatpush3.bf16.msra.mxu0 %v736_v19 }
  0x55   :  { %673 = vmatprep.subr.bf16.mxu0 %v866_v0 }
  0x58   :  { %674 = vmatpush3.bf16.msra.mxu0 %v737_v20 }
  0x59   :  { %675 = vmatprep.subr.bf16.mxu0 %v866_v0 }
  0x5c   :  { %676 = vmatpush3.bf16.msra.mxu0 %v738_v21 }
  0x5d   :  { %677 = vmatprep.subr.bf16.mxu0 %v866_v0 }
  0x60   :  { %678 = vmatpush3.bf16.msra.mxu0 %v739_v22 }
  0x61   :  { %679 = vmatprep.subr.bf16.mxu0 %v866_v0 }
  0x64   :  { %680 = vmatpush3.bf16.msra.mxu0 %v740_v23 }
  0x65   :  { %681 = vmatprep.subr.bf16.mxu0 %v866_v0 }
  0x68   :  { %682 = vmatpush3.bf16.msra.mxu0 %v741_v24 }
  0x69   :  { %683 = vmatprep.subr.bf16.mxu0 %v866_v0 }
  0x6c   :  { %684 = vmatpush3.bf16.msra.mxu0 %v742_v33 }
  0x6d   :  { %685 = vmatprep.subr.bf16.mxu0 %v866_v0 }
  0x70   :  { %686 = vmatpush3.bf16.msra.mxu0 %v743_v34 }
 0x113   :  { %v196_v26 = vpop.f32.mrf.mxu0 }
 0x114   :  { %v197_v27 = vadd.f32 %v559_v25, %v196_v26 }
 0x115   :  { %v649_v28 = vpop.f32.mrf.mxu0 }
 0x116   :  { %v202_v29 = vmax.f32 %v197_v27, 0.0 }
 0x117   :  { %v199_v30 = vpop.f32.mrf.mxu0 }
 0x118   :  { %v203_v31 = vpack.c.bf16 %v202_v29, %v202_v29 }
 0x119   :  { %v650_v32 = vpop.f32.mrf.mxu0 }
 0x11a   :  { %668 = vmatmul.mubr.bf16.vlgmr.msra.gmra.mxu1 %v203_v31 }
 0x11b   :  { %707 = vmatprep.mubr.msk.bf16.mxu1 %vm867_vm0, %v866_v0  ;;  %692 = vmatpush3.bf16.msra.mxu1 %v744_v35 }
 0x11c   :  { %693 = vmatprep.subr.bf16.mxu1 %v866_v0 }
 0x11f   :  { %694 = vmatpush3.bf16.msra.mxu1 %v745_v36 }
 0x120   :  { %695 = vmatprep.subr.bf16.mxu1 %v866_v0 }
 0x123   :  { %696 = vmatpush3.bf16.msra.mxu1 %v746_v37 }
 0x124   :  { %697 = vmatprep.subr.bf16.mxu1 %v866_v0 }
 0x127   :  { %698 = vmatpush3.bf16.msra.mxu1 %v747_v38 }
 0x128   :  { %699 = vmatprep.subr.bf16.mxu1 %v866_v0 }
 0x12b   :  { %700 = vmatpush3.bf16.msra.mxu1 %v748_v39 }
 0x12c   :  { %701 = vmatprep.subr.bf16.mxu1 %v866_v0 }
 0x12f   :  { %702 = vmatpush3.bf16.msra.mxu1 %v749_v40 }
 0x130   :  { %703 = vmatprep.subr.bf16.mxu1 %v866_v0 }
 0x133   :  { %704 = vmatpush3.bf16.msra.mxu1 %v750_v49 }
 0x134   :  { %705 = vmatprep.subr.bf16.mxu1 %v866_v0 }
 0x137   :  { %706 = vmatpush3.bf16.msra.mxu1 %v751_v50 }
 0x1da   :  { %v309_v42 = vpop.f32.mrf.mxu1 }
 0x1db   :  { %v310_v43 = vadd.f32 %v568_v41, %v309_v42 }
 0x1dc   :  { %v669_v44 = vpop.f32.mrf.mxu1 }
 0x1dd   :  { %v315_v45 = vmax.f32 %v310_v43, 0.0 }
 0x1de   :  { %v312_v46 = vpop.f32.mrf.mxu1 }
 0x1df   :  { %v316_v47 = vpack.c.bf16 %v315_v45, %v315_v45 }
 0x1e0   :  { %v670_v48 = vpop.f32.mrf.mxu1 }
 0x1e1   :  { %688 = vmatmul.mubr.bf16.vlgmr.msra.gmra.mxu0 %v316_v47 }
 0x2a1   :  { %v422_v52 = vpop.f32.mrf.mxu0 }
 0x2a2   :  { %v423_v53 = vadd.f32 %v577_v51, %v422_v52 }
 0x2a3   :  { %v689_v54 = vpop.f32.mrf.mxu0 }
 0x2a4   :  { %v428_v55 = vmax.f32 %v423_v53, 0.0 }
 0x2a5   :  { %v425_v56 = vpop.f32.mrf.mxu0 }
 0x2a6   :  { %v429_v57 = vpack.c.bf16 %v428_v55, %v428_v55 }
 0x2a7   :  { %v690_v58 = vpop.f32.mrf.mxu0 }
 0x2a8   :  { %708 = vmatmul.mubr.bf16.vlgmr.msra.gmra.mxu1 %v429_v57 }
 0x368   :  { %v535_v60 = vpop.f32.mrf.mxu1 }
 0x369   :  { %v536_v61 = vadd.f32 %v586_v59, %v535_v60 }
 0x36a   :  { %v709_v62 = vpop.f32.mrf.mxu1 }
 0x36b   :  { %541 = vst [vmem:[#allocation10] sm:$0xff] %v536_v61 }
 0x36c   :  { %v538_v63 = vpop.f32.mrf.mxu1 }
 0x36d   :  { %843 = shalt.err (!%p840_p10)
}
 0x36e   :  { %551 = dma.vmem_to_hbm [thread:$0]  %s549_s14, 128, %s1010_s9, [#allocation4]   ;;  %v710_v0 = vpop.f32.mrf.mxu1 }
 0x36f   :  { %858 = dma.done.wait [#allocation4], 128  }
 0x370   :  { %859 = vsyncadd [#allocation4], 4294967168 }
 0x371   :  { %555 = vsyncpa [#allocation3], 1 }
 0x372   :  { %556 = vsyncpa [#allocation6], 1 }
 0x373   :  { %557 = vsyncpa [#allocation9], 1 }
 0x374   :  { %558 = vsyncpa [#allocation4], 1 }

</bundles_post_ra>
